<compile_context>
chip_gen: v5e
topology: v5e:2x2
jax: 0.10.0
libtpu: 0.0.40
codegen_flags: <defaults>
</compile_context>

<pallas_src>
import jax
import jax.numpy as jnp
from jax.experimental import pallas as pl
from jax.experimental.pallas import tpu as pltpu


# ----------------------------- kernels -------------------------------------


def _head_matmul_kernel(x_ref, w_ref, b_ref, o_ref):
    # Lane-dense path: pooling folded into the MXU contraction.
    # x_ref : (TB, C*HW)   one contiguous lane-dense feature row per batch elem
    # w_ref : (C*HW, NPAD) HW-replicated fc weight, pre-scaled by 1/HW (x dtype)
    # b_ref : (1, NPAD)    fc bias (f32), lane-padded to a multiple of 128
    # o_ref : (TB, NPAD)   padded logits (lane-dense, unmasked store)
    acc = jnp.dot(x_ref[...], w_ref[...], preferred_element_type=jnp.float32)
    o_ref[...] = (acc + b_ref[...]).astype(o_ref.dtype)


def _head_pool_kernel(x_ref, w_ref, b_ref, o_ref):
    # Explicit-pooling path (tiny batches): spatial sum with f32 accumulation
    # (no full-tile f32 copy); the 1/HW mean scale is folded into the weight.
    # x_ref : (TB, C, HW); w_ref : (C, NPAD) f32; b_ref : (1, NPAD); o_ref : (TB, NPAD)
    pooled = jnp.sum(x_ref[...], axis=-1, dtype=jnp.float32)          # (TB, C)
    acc = jnp.dot(pooled, w_ref[...], preferred_element_type=jnp.float32)
    o_ref[...] = (acc + b_ref[...]).astype(o_ref.dtype)


# ----------------------------- helpers -------------------------------------


def _round_up(x, m):
    return ((x + m - 1) // m) * m


def _vmem_limit_bytes():
    # Budget half of physical VMEM: 64 MiB on v5e/v6e (128 MiB), 32 MiB on v7x
    # (64 MiB).  Conservative 32 MiB fallback if the query is unavailable.
    try:
        cap = pltpu.get_tpu_info().vmem_capacity_bytes
    except Exception:
        cap = 64 * 1024 * 1024
    return int(min(64 * 1024 * 1024, max(32 * 1024 * 1024, cap // 2)))


def _pick_batch_tile(batch, bytes_per_row, cap_bytes):
    """Batch-tile heuristic:
       * block stays near cap_bytes (computed from lane-PADDED bytes upstream),
       * for B >= 16, keep >= ~8 grid steps (v7x: both TensorCores busy, DMA
         pipeline stays full),
       * tb is the full batch or a multiple of 8 (sublane-dense stores and
         valid (8,128) block alignment under cdiv tiling)."""
    tb = max(1, min(batch, cap_bytes // max(1, bytes_per_row)))
    if batch >= 16:
        tb = min(tb, max(8, -(-batch // 8)))      # cap tb -> >= ~8 grid steps
    if tb < batch:
        tb = max(8, (tb // 8) * 8)                # 8-aligned partial tiles
        tb = min(tb, batch)
    return tb


# ----------------------------- wrapper -------------------------------------


def classification_head(x_nchw, w, b, *, pool_in_mxu=None):
    """Pallas-fused ClassificationHead (AdaptiveAvgPool2d((1,1)) -> Flatten -> Linear).

    x_nchw : [B, C, H, W]  backbone last feature map (NCHW; f32 or bf16)
    w      : [num_classes, C]  (PyTorch nn.Linear weight layout)
    b      : [num_classes]
    returns: [B, num_classes] float32 logits
    """
    B, C, H, W = x_nchw.shape
    HW = H * W
    num_classes = w.shape[0]
    npad = _round_up(num_classes, 128)
    itemsize = jnp.dtype(x_nchw.dtype).itemsize

    # fc weight transposed, class-axis zero-padded to 128 lanes, 1/HW pooling
    # scale folded in (AdaptiveAvgPool2d((1,1)) == spatial sum * (1/HW)).
    w_scaled = jnp.transpose(w, (1, 0)).astype(jnp.float32) * (1.0 / HW)
    w_pad = jnp.zeros((C, npad), jnp.float32).at[:, :num_classes].set(w_scaled)
    b_pad = jnp.zeros((1, npad), jnp.float32).at[:, :num_classes].set(
        b.astype(jnp.float32).reshape(1, num_classes))

    if pool_in_mxu is None:
        # The MXU-folded path needs a (C*HW, npad) replicated weight; only use
        # it when the feature-map traffic dominates that constant.
        pool_in_mxu = (B * C * HW * itemsize) >= 2 * (C * HW * npad * itemsize)

    vmem_limit = _vmem_limit_bytes()

    if pool_in_mxu:
        # ---- lane-dense 2-D features, pooling folded into the matmul ----
        x_flat = x_nchw.reshape(B, C * HW)        # free reshape of contiguous NCHW
        w_rep = (jnp.broadcast_to(w_pad[:, None, :], (C, HW, npad))
                 .reshape(C * HW, npad).astype(x_nchw.dtype))
        # Lane-dense rows -> raw bytes == padded bytes; 8 MiB block cap.
        tb = _pick_batch_tile(B, C * HW * itemsize, cap_bytes=8 * 1024 * 1024)
        grid = (pl.cdiv(B, tb),)
        cost = pl.CostEstimate(
            flops=2 * B * C * HW * npad,
            transcendentals=0,
            bytes_accessed=(B * C * HW * itemsize + C * HW * npad * itemsize
                            + npad * 4 + B * npad * 4))
        out_pad = pl.pallas_call(
            _head_matmul_kernel,
            out_shape=jax.ShapeDtypeStruct((B, npad), jnp.float32),
            grid=grid,
            in_specs=[
                pl.BlockSpec((tb, C * HW), lambda i: (i, 0)),   # batch-tiled features
                pl.BlockSpec((C * HW, npad), lambda i: (0, 0)),  # resident W_rep
                pl.BlockSpec((1, npad), lambda i: (0, 0)),       # resident bias
            ],
            out_specs=pl.BlockSpec((tb, npad), lambda i: (i, 0)),
            compiler_params=pltpu.CompilerParams(
                dimension_semantics=("parallel",),
                vmem_limit_bytes=vmem_limit),
            cost_estimate=cost,
        )(x_flat, w_rep, b_pad)
    else:
        # ---- explicit pooling (tiny batches) ----
        x_k = x_nchw.reshape(B, C, HW)            # free reshape of contiguous NCHW
        # VMEM budget from lane-PADDED bytes (HW pads up to 128 lanes); 4 MiB cap
        # keeps the double-buffered block comfortably inside v7x's 32 MiB budget.
        padded_row = C * _round_up(HW, 128) * itemsize
        tb = _pick_batch_tile(B, padded_row, cap_bytes=4 * 1024 * 1024)
        grid = (pl.cdiv(B, tb),)
        cost = pl.CostEstimate(
            flops=B * C * HW + 2 * B * C * npad,
            transcendentals=0,
            bytes_accessed=(B * C * HW * itemsize + C * npad * 4
                            + npad * 4 + B * npad * 4))
        out_pad = pl.pallas_call(
            _head_pool_kernel,
            out_shape=jax.ShapeDtypeStruct((B, npad), jnp.float32),
            grid=grid,
            in_specs=[
                pl.BlockSpec((tb, C, HW), lambda i: (i, 0, 0)),  # batch-tiled features
                pl.BlockSpec((C, npad), lambda i: (0, 0)),       # resident weight
                pl.BlockSpec((1, npad), lambda i: (0, 0)),       # resident bias
            ],
            out_specs=pl.BlockSpec((tb, npad), lambda i: (i, 0)),
            compiler_params=pltpu.CompilerParams(
                dimension_semantics=("parallel",),
                vmem_limit_bytes=vmem_limit),
            cost_estimate=cost,
        )(x_k, w_pad, b_pad)

    # NOTE: if the input DMA is still exposed on v5e/v6e traces, bump the x
    # BlockSpec to pipeline_mode=pl.Buffered(3) (extra VMEM headroom exists there).
    return out_pad[:, :num_classes]


def encoder_decoder_forward(last_feature_nchw, fc_w, fc_b):
    """EncoderDecoder.forward (label=None path): decode_head(backbone(rgb)[-1])."""
    return classification_head(last_feature_nchw, fc_w, fc_b)


if __name__ == "__main__":
    key = jax.random.PRNGKey(0)
    k_x, k_w, k_b = jax.random.split(key, 3)

    B, C, H, W = 2, 256, 8, 8          # decode_head dim = 256 (as in the module)
    NUM_CLASSES = 10

    # Synthetic "backbone last-stage feature map" standing in for x[-1],
    # carried as bfloat16 (as a bf16 backbone would emit).
    x_last = jax.random.normal(k_x, (B, C, H, W), dtype=jnp.float32).astype(jnp.bfloat16)

    # Deterministic fc params (nn.Linear(256, num_classes) shapes).
    fc_w = jax.random.normal(k_w, (NUM_CLASSES, C), dtype=jnp.float32) * (1.0 / jnp.sqrt(C))
    fc_b = jax.random.normal(k_b, (NUM_CLASSES,), dtype=jnp.float32) * 0.01

    # Reference in plain JAX (f32 accumulation from the same bf16 features).
    ref = jnp.mean(x_last.astype(jnp.float32), axis=(2, 3)) @ fc_w.T + fc_b

    # Default (auto) path: tiny batch -> explicit-pool kernel, f32 weights.
    out = encoder_decoder_forward(x_last, fc_w, fc_b)
    out = jax.block_until_ready(out)
    assert out.shape == (B, NUM_CLASSES)
    assert jnp.allclose(out, ref, atol=1e-3, rtol=1e-3)

    # Also exercise the lane-dense MXU-folded-pooling path (preferred for large
    # batches); weight is replicated in bf16, so use a slightly looser tolerance.
    out_mxu = classification_head(x_last, fc_w, fc_b, pool_in_mxu=True)
    out_mxu = jax.block_until_ready(out_mxu)
    assert out_mxu.shape == (B, NUM_CLASSES)
    assert jnp.allclose(out_mxu, ref, atol=5e-3, rtol=5e-3)

    print("KERNEL_OK")
</pallas_src>

<mosaic_0001>
module attributes {stable_mosaic.version = 11 : i64} {
  func.func @_head_pool_kernel(%arg0: i32, %arg1: memref<2x256x64xbf16, #tpu.memory_space<vmem>>, %arg2: memref<256x128xf32, #tpu.memory_space<vmem>>, %arg3: memref<1x128xf32, #tpu.memory_space<vmem>>, %arg4: memref<2x128xf32, #tpu.memory_space<vmem>>) attributes {dimension_semantics = [#tpu.dimension_semantics<parallel>], iteration_bounds = array<i64: 1>, scalar_prefetch = 0 : i64, scratch_operands = 0 : i64, tpu.core_type = #tpu.core_type<tc>, window_params = [{transform_indices = @transform_0, window_bounds = array<i64: 2, 256, 64>}, {pipeline_mode = #tpu.pipeline_mode<synchronous>, transform_indices = @transform_1, window_bounds = array<i64: 256, 128>}, {pipeline_mode = #tpu.pipeline_mode<synchronous>, transform_indices = @transform_2, window_bounds = array<i64: 1, 128>}, {transform_indices = @transform_3, window_bounds = array<i64: 2, 128>}]} {
    %c0 = arith.constant 0 : index
    %c0_0 = arith.constant 0 : index
    %c0_1 = arith.constant 0 : index
    %0 = vector.load %arg1[%c0, %c0_0, %c0_1] : memref<2x256x64xbf16, #tpu.memory_space<vmem>>, vector<2x256x64xbf16>
    %1 = arith.extf %0 : vector<2x256x64xbf16> to vector<2x256x64xf32>
    %cst = arith.constant dense<0.000000e+00> : vector<2x256xf32>
    %2 = vector.multi_reduction <add>, %1, %cst [2] : vector<2x256x64xf32> to vector<2x256xf32>
    %c0_2 = arith.constant 0 : index
    %c0_3 = arith.constant 0 : index
    %3 = vector.load %arg2[%c0_2, %c0_3] : memref<256x128xf32, #tpu.memory_space<vmem>>, vector<256x128xf32>
    %cst_4 = arith.constant dense<0.000000e+00> : vector<2x128xf32>
    %4 = tpu.matmul %2, %3, %cst_4 {dimension_numbers = #tpu.dot_dimension_numbers<[1], [0], [0], [1], [0, 0, 1, 1], [], []>} : vector<2x256xf32>, vector<256x128xf32>, vector<2x128xf32> -> vector<2x128xf32>
    %c0_5 = arith.constant 0 : index
    %c0_6 = arith.constant 0 : index
    %5 = vector.load %arg3[%c0_5, %c0_6] : memref<1x128xf32, #tpu.memory_space<vmem>>, vector<1x128xf32>
    %6 = vector.broadcast %5 : vector<1x128xf32> to vector<2x128xf32>
    %7 = arith.addf %4, %6 : vector<2x128xf32>
    %c0_7 = arith.constant 0 : index
    %c0_8 = arith.constant 0 : index
    %8 = vector.load %arg4[%c0_7, %c0_8] : memref<2x128xf32, #tpu.memory_space<vmem>>, vector<2x128xf32>
    tpu.vector_store %arg4[%c0_7, %c0_8], %7 {strides = array<i32>} : memref<2x128xf32, #tpu.memory_space<vmem>>, vector<2x128xf32>,
    return
  }
  func.func @transform_0(%arg0: i32) -> (i32, i32, i32) {
    %c0_i32 = arith.constant 0 : i32
    %c0_i32_0 = arith.constant 0 : i32
    %c0_i32_1 = arith.constant 0 : i32
    return %arg0, %c0_i32, %c0_i32_0 : i32, i32, i32
  }
  func.func @transform_1(%arg0: i32) -> (i32, i32) {
    %c0_i32 = arith.constant 0 : i32
    %c0_i32_0 = arith.constant 0 : i32
    %c0_i32_1 = arith.constant 0 : i32
    return %c0_i32, %c0_i32_0 : i32, i32
  }
  func.func @transform_2(%arg0: i32) -> (i32, i32) {
    %c0_i32 = arith.constant 0 : i32
    %c0_i32_0 = arith.constant 0 : i32
    %c0_i32_1 = arith.constant 0 : i32
    return %c0_i32, %c0_i32_0 : i32, i32
  }
  func.func @transform_3(%arg0: i32) -> (i32, i32) {
    %c0_i32 = arith.constant 0 : i32
    %c0_i32_0 = arith.constant 0 : i32
    return %arg0, %c0_i32 : i32, i32
  }
}

</mosaic_0001>

<bundles_post_ra>
// kernel: tpu_custom_call.1
= control target key start
LH: loop header
LB: loop body
LE: loop exit
PB: predicated region body
PF: predicated region fallthrough
CT: control target
= control target key end

     0   :  { %vm143_vm0 = vcmask 523264   ;;  %s1342_s0 = inlined_call_operand.vmem [shape: bf16[2,256,64], index: 0, kind: input, shape index: {}]   ;;  %s1343_s1 = inlined_call_operand.vmem [shape: f32[256,128], index: 1, kind: input, shape index: {}]   ;;  %s1344_s2 = inlined_call_operand.vmem [shape: f32[1,128], index: 2, kind: input, shape index: {}]   ;;  %s1345_s3 = inlined_call_operand.hbm [shape: f32[2,128], index: 3, kind: output, shape index: {}]  }
   0x1   :  { %v797_v0 = vld [vmem:[%s1342_s0 + $0x80] sm:$0xff]   ;;  %v782_v1 = vld [vmem:[%s1342_s0 + $0x8] sm:$0xff]  }
   0x2   :  { %v655_v2 = vld [vmem:[%s1342_s0] sm:$0xff]   ;;  %v720_v3 = vunpack.c.l.bf16 %v797_v0  ;;  %v660_v4 = vunpack.c.l.bf16 %v782_v1  ;;  %v798_v6 = vld [vmem:[%s1342_s0 + $0x88] sm:$0xff]  }
   0x3   :  { %v656_v5 = vunpack.c.l.bf16 %v655_v2 }
   0x4   :  { %v240_v7 = vsel %vm143_vm0, %v720_v3, 0.0  ;;  %v150_v8 = vsel %vm143_vm0, %v660_v4, 0.0 }
   0x5   :  { %v144_v9 = vsel %vm143_vm0, %v656_v5, 0.0  ;;  %241 = vadd.xlane.f32.xlu1 %v240_v7  ;;  %151 = vadd.xlane.f32.xlu2 %v150_v8 }
   0x6   :  { %8 = vsyncpa [#allocation3], 0  ;;  %145 = vadd.xlane.f32.xlu0 %v144_v9  ;;  %v721_v10 = vunpack.c.h.bf16 %v797_v0  ;;  %v724_v11 = vunpack.c.l.bf16 %v798_v6  ;;  %v657_v12 = vunpack.c.h.bf16 %v655_v2  ;;  %v789_v16 = vld [vmem:[%s1342_s0 + $0x40] sm:$0xff]   ;;  %v661_v19 = vunpack.c.h.bf16 %v782_v1  ;;  %v790_v30 = vld [vmem:[%s1342_s0 + $0x48] sm:$0xff]   ;;  %s841_s30 = smov [#allocation2]   ;;  %s645_s7 = sshll.u32 %s1345_s3, 4  ;;  %s646_s7 = int_to_ptr.hbm [resolvable:$true] %s645_s7 }
   0x7   :  { %v688_v17 = vunpack.c.l.bf16 %v789_v16  ;;  %v689_v18 = vunpack.c.h.bf16 %v789_v16  ;;  %v805_v23 = vld [vmem:[%s1342_s0 + $0xc0] sm:$0xff]   ;;  %v725_v26 = vunpack.c.h.bf16 %v798_v6  ;;  %v799_v31 = vld [vmem:[%s1342_s0 + $0x90] sm:$0xff]   ;;  %v692_v33 = vunpack.c.l.bf16 %v790_v30  ;;  %v806_v39 = vld [vmem:[%s1342_s0 + $0xc8] sm:$0xff]   ;;  %s643_s4 = sshll.u32 %s841_s30, 4  ;;  %s644_s4 = int_to_ptr.vmem [resolvable:$true] %s643_s4 }
   0x8   :  { %v243_v13 = vsel %vm143_vm0, %v721_v10, 0.0  ;;  %v246_v14 = vsel %vm143_vm0, %v724_v11, 0.0  ;;  %v147_v15 = vsel %vm143_vm0, %v657_v12, 0.0  ;;  %v153_v22 = vsel %vm143_vm0, %v661_v19, 0.0  ;;  %v783_v32 = vld [vmem:[%s1342_s0 + $0x10] sm:$0xff]   ;;  %v784_v46 = vld [vmem:[%s1342_s0 + $0x18] sm:$0xff]  }
   0x9   :  { %v192_v20 = vsel %vm143_vm0, %v688_v17, 0.0  ;;  %v195_v21 = vsel %vm143_vm0, %v689_v18, 0.0  ;;  %v752_v24 = vunpack.c.l.bf16 %v805_v23  ;;  %v753_v25 = vunpack.c.h.bf16 %v805_v23  ;;  %v800_v53 = vld [vmem:[%s1342_s0 + $0x98] sm:$0xff]   ;;  %v807_v54 = vld [vmem:[%s1342_s0 + $0xd0] sm:$0xff]   ;;  %v785_v4 = vld [vmem:[%s1342_s0 + $0x20] sm:$0xff]  }
   0xa   :  { %v249_v29 = vsel %vm143_vm0, %v725_v26, 0.0  ;;  %v728_v34 = vunpack.c.l.bf16 %v799_v31  ;;  %v664_v35 = vunpack.c.l.bf16 %v783_v32  ;;  %v198_v36 = vsel %vm143_vm0, %v692_v33, 0.0  ;;  %v791_v55 = vld [vmem:[%s1342_s0 + $0x50] sm:$0xff]   ;;  %v792_v5 = vld [vmem:[%s1342_s0 + $0x58] sm:$0xff]   ;;  %v793_v26 = vld [vmem:[%s1342_s0 + $0x60] sm:$0xff]  }
   0xb   :  { %v288_v27 = vsel %vm143_vm0, %v752_v24, 0.0  ;;  %v291_v28 = vsel %vm143_vm0, %v753_v25, 0.0  ;;  %v665_v40 = vunpack.c.h.bf16 %v783_v32  ;;  %v693_v41 = vunpack.c.h.bf16 %v790_v30  ;;  %v808_v12 = vld [vmem:[%s1342_s0 + $0xd8] sm:$0xff]  }
   0xc   :  { %v252_v37 = vsel %vm143_vm0, %v728_v34, 0.0  ;;  %v156_v38 = vsel %vm143_vm0, %v664_v35, 0.0  ;;  %v756_v42 = vunpack.c.l.bf16 %v806_v39  ;;  %v757_v47 = vunpack.c.h.bf16 %v806_v39  ;;  %v809_v35 = vld [vmem:[%s1342_s0 + $0xe0] sm:$0xff]  }
   0xd   :  { %244 = vadd.xlane.f32.xlu1 %v243_v13  ;;  %247 = vadd.xlane.f32.xlu2 %v246_v14  ;;  %v159_v43 = vsel %vm143_vm0, %v665_v40, 0.0  ;;  %v201_v44 = vsel %vm143_vm0, %v693_v41, 0.0  ;;  %v668_v48 = vunpack.c.l.bf16 %v784_v46  ;;  %v729_v49 = vunpack.c.h.bf16 %v799_v31  ;;  %v801_v13 = vld [vmem:[%s1342_s0 + $0xa0] sm:$0xff]  }
   0xe   :  { %148 = vadd.xlane.f32.xlu0 %v147_v15  ;;  %v294_v45 = vsel %vm143_vm0, %v756_v42, 0.0  ;;  %v297_v50 = vsel %vm143_vm0, %v757_v47, 0.0  ;;  %v732_v56 = vunpack.c.l.bf16 %v800_v53  ;;  %v760_v57 = vunpack.c.l.bf16 %v807_v54  ;;  %v787_v42 = vld [vmem:[%s1342_s0 + $0x30] sm:$0xff]  }
   0xf   :  { %v162_v51 = vsel %vm143_vm0, %v668_v48, 0.0  ;;  %v255_v52 = vsel %vm143_vm0, %v729_v49, 0.0  ;;  %v696_v58 = vunpack.c.l.bf16 %v791_v55  ;;  %v697_v62 = vunpack.c.h.bf16 %v791_v55  ;;  %v803_v49 = vld [vmem:[%s1342_s0 + $0xb0] sm:$0xff]  }
  0x10   :  { %v258_v59 = vsel %vm143_vm0, %v732_v56, 0.0  ;;  %v300_v60 = vsel %vm143_vm0, %v760_v57, 0.0  ;;  %v733_v63 = vunpack.c.h.bf16 %v800_v53  ;;  %v669_v0 = vunpack.c.h.bf16 %v784_v46 }
  0x11   :  { %v204_v61 = vsel %vm143_vm0, %v696_v58, 0.0  ;;  %v207_v1 = vsel %vm143_vm0, %v697_v62, 0.0  ;;  %v672_v6 = vunpack.c.l.bf16 %v785_v4  ;;  %v700_v7 = vunpack.c.l.bf16 %v792_v5 }
  0x12   :  { %v261_v2 = vsel %vm143_vm0, %v733_v63, 0.0  ;;  %v165_v3 = vsel %vm143_vm0, %v669_v0, 0.0  ;;  %v761_v8 = vunpack.c.h.bf16 %v807_v54  ;;  %v764_v14 = vunpack.c.l.bf16 %v808_v12 }
  0x13   :  { %v168_v9 = vsel %vm143_vm0, %v672_v6, 0.0  ;;  %v210_v10 = vsel %vm143_vm0, %v700_v7, 0.0  ;;  %v673_v15 = vunpack.c.h.bf16 %v785_v4  ;;  %v736_v16 = vunpack.c.l.bf16 %v801_v13 }
  0x14   :  { %v303_v11 = vsel %vm143_vm0, %v761_v8, 0.0  ;;  %v306_v17 = vsel %vm143_vm0, %v764_v14, 0.0  ;;  %v436_v54 = vlaneseq  ;;  %v681_v4 = vunpack.c.h.bf16 %v787_v42 }
  0x15   :  { %193 = vadd.xlane.f32.xlu1 %v192_v20  ;;  %196 = vadd.xlane.f32.xlu2 %v195_v21  ;;  %v171_v18 = vsel %vm143_vm0, %v673_v15, 0.0  ;;  %v264_v19 = vsel %vm143_vm0, %v736_v16, 0.0  ;;  %v737_v20 = vunpack.c.h.bf16 %v801_v13  ;;  %v765_v21 = vunpack.c.h.bf16 %v808_v12 }
  0x16   :  { %154 = vadd.xlane.f32.xlu0 %v153_v22  ;;  %v701_v22 = vunpack.c.h.bf16 %v792_v5  ;;  %vm441_vm1 = vcmask 130112   ;;  %vm445_vm2 = vcmask 195712   ;;  %v183_v16 = vsel %vm143_vm0, %v681_v4, 0.0 }
  0x17   :  { %v267_v23 = vsel %vm143_vm0, %v737_v20, 0.0  ;;  %v309_v24 = vsel %vm143_vm0, %v765_v21, 0.0  ;;  %vm449_vm3 = vcmask 261312   ;;  %vm453_vm4 = vcmask 326912  }
  0x18   :  { %v213_v25 = vsel %vm143_vm0, %v701_v22, 0.0  ;;  %vm457_vm5 = vcmask 392512   ;;  %vm461_vm6 = vcmask 458112   ;;  %vm465_vm7 = vcmask 523712  }
  0x19   :  { %vm469_vm8 = vcmask 589312   ;;  %vm473_vm9 = vcmask 654912   ;;  %vm477_vm10 = vcmask 720512   ;;  %vm481_vm11 = vcmask 786112  }
  0x1a   :  { %vm485_vm12 = vcmask 851712   ;;  %vm489_vm13 = vcmask 917312   ;;  %vm493_vm14 = vcmask 982912   ;;  %vm497_vm15 = vcmask 1048512  }
  0x1d   :  { %289 = vadd.xlane.f32.xlu1 %v288_v27  ;;  %292 = vadd.xlane.f32.xlu2 %v291_v28  ;;  %v802_v27 = vld [vmem:[%s1342_s0 + $0xa8] sm:$0xff]  }
  0x1e   :  { %250 = vadd.xlane.f32.xlu0 %v249_v29  ;;  %v786_v28 = vld [vmem:[%s1342_s0 + $0x28] sm:$0xff]   ;;  %v704_v29 = vunpack.c.l.bf16 %v793_v26  ;;  %v740_v30 = vunpack.c.l.bf16 %v802_v27 }
  0x1f   :  { %v676_v31 = vunpack.c.l.bf16 %v786_v28 }
  0x20   :  { %v216_v32 = vsel %vm143_vm0, %v704_v29, 0.0  ;;  %v270_v33 = vsel %vm143_vm0, %v740_v30, 0.0 }
  0x21   :  { %v174_v34 = vsel %vm143_vm0, %v676_v31, 0.0 }
  0x25   :  { %199 = vadd.xlane.f32.xlu1 %v198_v36  ;;  %253 = vadd.xlane.f32.xlu2 %v252_v37  ;;  %v677_v36 = vunpack.c.h.bf16 %v786_v28  ;;  %v705_v37 = vunpack.c.h.bf16 %v793_v26 }
  0x26   :  { %157 = vadd.xlane.f32.xlu0 %v156_v38  ;;  %v768_v38 = vunpack.c.l.bf16 %v809_v35 }
  0x27   :  { %v177_v39 = vsel %vm143_vm0, %v677_v36, 0.0  ;;  %v219_v40 = vsel %vm143_vm0, %v705_v37, 0.0  ;;  %v811_v36 = vld [vmem:[%s1342_s0 + $0xf0] sm:$0xff]  }
  0x28   :  { %v312_v41 = vsel %vm143_vm0, %v768_v38, 0.0  ;;  %v804_v38 = vld [vmem:[%s1342_s0 + $0xb8] sm:$0xff]  }
  0x2d   :  { %160 = vadd.xlane.f32.xlu1 %v159_v43  ;;  %202 = vadd.xlane.f32.xlu2 %v201_v44  ;;  %v769_v43 = vunpack.c.h.bf16 %v809_v35  ;;  %v680_v44 = vunpack.c.l.bf16 %v787_v42 }
  0x2e   :  { %295 = vadd.xlane.f32.xlu0 %v294_v45  ;;  %v741_v45 = vunpack.c.h.bf16 %v802_v27 }
  0x2f   :  { %v315_v46 = vsel %vm143_vm0, %v769_v43, 0.0  ;;  %v180_v47 = vsel %vm143_vm0, %v680_v44, 0.0 }
  0x30   :  { %v273_v48 = vsel %vm143_vm0, %v741_v45, 0.0 }
  0x35   :  { %298 = vadd.xlane.f32.xlu1 %v297_v50  ;;  %163 = vadd.xlane.f32.xlu2 %v162_v51  ;;  %v810_v50 = vld [vmem:[%s1342_s0 + $0xe8] sm:$0xff]  }
  0x36   :  { %256 = vadd.xlane.f32.xlu0 %v255_v52  ;;  %v794_v51 = vld [vmem:[%s1342_s0 + $0x68] sm:$0xff]   ;;  %v744_v52 = vunpack.c.l.bf16 %v803_v49  ;;  %v772_v53 = vunpack.c.l.bf16 %v810_v50 }
  0x37   :  { %v708_v55 = vunpack.c.l.bf16 %v794_v51 }
  0x39   :  { %v222_v62 = vsel %vm143_vm0, %v708_v55, 0.0  ;;  %v777_v55 = vunpack.c.h.bf16 %v811_v36 }
  0x3d   :  { %259 = vadd.xlane.f32.xlu1 %v258_v59  ;;  %301 = vadd.xlane.f32.xlu2 %v300_v60  ;;  %v276_v59 = vsel %vm143_vm0, %v744_v52, 0.0  ;;  %v318_v60 = vsel %vm143_vm0, %v772_v53, 0.0 }
  0x3e   :  { %205 = vadd.xlane.f32.xlu0 %v204_v61  ;;  %v987_v61 = vand.u32 127, %v436_v54  ;;  %v749_v54 = vunpack.c.h.bf16 %v804_v38 }
  0x40   :  { %v991_v63 = vadd.s32 4294967280, %v987_v61  ;;  %v439_v0 = vadd.s32 4294967288, %v987_v61  ;;  %v1012_v22 = vadd.s32 4294967272, %v987_v61  ;;  %v1035_v53 = vadd.s32 4294967264, %v987_v61 }
  0x45   :  { %208 = vadd.xlane.f32.xlu1 %v207_v1  ;;  %262 = vadd.xlane.f32.xlu2 %v261_v2  ;;  %v709_v1 = vunpack.c.h.bf16 %v794_v51  ;;  %v745_v2 = vunpack.c.h.bf16 %v803_v49 }
  0x46   :  { %166 = vadd.xlane.f32.xlu0 %v165_v3 }
  0x47   :  { %v225_v13 = vsel %vm143_vm0, %v709_v1, 0.0  ;;  %v279_v14 = vsel %vm143_vm0, %v745_v2, 0.0  ;;  %v285_v1 = vsel %vm143_vm0, %v749_v54, 0.0  ;;  %v327_v2 = vsel %vm143_vm0, %v777_v55, 0.0 }
  0x48   :  { %v1082_v55 = vadd.s32 4294967232, %v987_v61 }
  0x4d   :  { %169 = vadd.xlane.f32.xlu1 %v168_v9  ;;  %211 = vadd.xlane.f32.xlu2 %v210_v10 }
  0x4e   :  { %304 = vadd.xlane.f32.xlu0 %v303_v11 }
  0x55   :  { %307 = vadd.xlane.f32.xlu1 %v306_v17  ;;  %172 = vadd.xlane.f32.xlu2 %v171_v18  ;;  %v788_v17 = vld [vmem:[%s1342_s0 + $0x38] sm:$0xff]   ;;  %v795_v18 = vld [vmem:[%s1342_s0 + $0x70] sm:$0xff]  }
  0x56   :  { %265 = vadd.xlane.f32.xlu0 %v264_v19 }
  0x5d   :  { %268 = vadd.xlane.f32.xlu1 %v267_v23  ;;  %310 = vadd.xlane.f32.xlu2 %v309_v24  ;;  %v684_v23 = vunpack.c.l.bf16 %v788_v17  ;;  %v712_v24 = vunpack.c.l.bf16 %v795_v18 }
  0x5e   :  { %214 = vadd.xlane.f32.xlu0 %v213_v25  ;;  %v773_v25 = vunpack.c.h.bf16 %v810_v50 }
  0x60   :  { %v321_v35 = vsel %vm143_vm0, %v773_v25, 0.0 }
  0x65   :  { %217 = vadd.xlane.f32.xlu1 %v216_v32  ;;  %271 = vadd.xlane.f32.xlu2 %v270_v33  ;;  %v186_v32 = vsel %vm143_vm0, %v684_v23, 0.0  ;;  %v228_v33 = vsel %vm143_vm0, %v712_v24, 0.0 }
  0x66   :  { %175 = vadd.xlane.f32.xlu0 %v174_v34 }
  0x6d   :  { %178 = vadd.xlane.f32.xlu1 %v177_v39  ;;  %220 = vadd.xlane.f32.xlu2 %v219_v40  ;;  %v776_v39 = vunpack.c.l.bf16 %v811_v36  ;;  %v685_v40 = vunpack.c.h.bf16 %v788_v17 }
  0x6e   :  { %313 = vadd.xlane.f32.xlu0 %v312_v41  ;;  %v748_v41 = vunpack.c.l.bf16 %v804_v38 }
  0x6f   :  { %v189_v49 = vsel %vm143_vm0, %v685_v40, 0.0 }
  0x70   :  { %v282_v51 = vsel %vm143_vm0, %v748_v41, 0.0 }
  0x75   :  { %316 = vadd.xlane.f32.xlu1 %v315_v46  ;;  %181 = vadd.xlane.f32.xlu2 %v180_v47 }
  0x76   :  { %274 = vadd.xlane.f32.xlu0 %v273_v48  ;;  %v324_v48 = vsel %vm143_vm0, %v776_v39, 0.0 }
  0x78   :  { %v242_v56 = vpop.xlane.xlu1 %241  ;;  %v152_v57 = vpop.xlane.xlu2 %151 }
  0x79   :  { %v146_v58 = vpop.xlane.xlu0 %145  ;;  %v530_v3 = vperm.slane %v242_v56, %v987_v61  ;;  %v444_v7 = vperm.slane %v152_v57, %v991_v63  ;;  %v713_v56 = vunpack.c.h.bf16 %v795_v18 }
  0x7a   :  { %v438_v11 = vperm.slane %v146_v58, %v987_v61 }
  0x7d   :  { %277 = vadd.xlane.f32.xlu1 %v276_v59  ;;  %319 = vadd.xlane.f32.xlu2 %v318_v60 }
  0x7e   :  { %223 = vadd.xlane.f32.xlu0 %v222_v62 }
  0x80   :  { %v245_v5 = vpop.xlane.xlu1 %244  ;;  %v248_v6 = vpop.xlane.xlu2 %247 }
  0x81   :  { %v531_v8 = vperm.slane %v245_v5, %v439_v0  ;;  %v533_v9 = vperm.slane %v248_v6, %v991_v63  ;;  %v149_v10 = vpop.xlane.xlu0 %148  ;;  %v231_v5 = vsel %vm143_vm0, %v713_v56, 0.0  ;;  %v812_v6 = vld [vmem:[%s1342_s0 + $0xf8] sm:$0xff]  }
  0x82   :  { %v440_v12 = vperm.slane %v149_v10, %v439_v0  ;;  %v780_v10 = vunpack.c.l.bf16 %v812_v6 }
  0x83   :  { %v532_v15 = vsel %vm441_vm1, %v531_v8, %v530_v3 }
  0x84   :  { %v534_v19 = vsel %vm445_vm2, %v533_v9, %v532_v15  ;;  %v442_v20 = vsel %vm441_vm1, %v440_v12, %v438_v11  ;;  %v1053_v9 = vadd.s32 4294967256, %v987_v61 }
  0x85   :  { %226 = vadd.xlane.f32.xlu1 %v225_v13  ;;  %280 = vadd.xlane.f32.xlu2 %v279_v14  ;;  %v446_v21 = vsel %vm445_vm2, %v444_v7, %v442_v20  ;;  %v796_v7 = vld [vmem:[%s1342_s0 + $0x78] sm:$0xff]  }
  0x86   :  { %184 = vadd.xlane.f32.xlu0 %v183_v16  ;;  %v717_v11 = vunpack.c.h.bf16 %v796_v7  ;;  %v716_v12 = vunpack.c.l.bf16 %v796_v7 }
  0x88   :  { %v194_v26 = vpop.xlane.xlu1 %193  ;;  %v197_v27 = vpop.xlane.xlu2 %196  ;;  %v237_v20 = vsel %vm143_vm0, %v717_v11, 0.0  ;;  %v234_v24 = vsel %vm143_vm0, %v716_v12, 0.0 }
  0x89   :  { %v499_v28 = vperm.slane %v194_v26, %v987_v61  ;;  %v500_v29 = vperm.slane %v197_v27, %v439_v0  ;;  %v155_v30 = vpop.xlane.xlu0 %154  ;;  %v459_v26 = vadd.s32 4294967248, %v987_v61  ;;  %v781_v27 = vunpack.c.h.bf16 %v812_v6 }
  0x8a   :  { %v448_v31 = vperm.slane %v155_v30, %v1012_v22 }
  0x8b   :  { %v501_v34 = vsel %vm441_vm1, %v500_v29, %v499_v28 }
  0x8c   :  { %v450_v37 = vsel %vm449_vm3, %v448_v31, %v446_v21 }
  0x8d   :  { %187 = vadd.xlane.f32.xlu1 %v186_v32  ;;  %229 = vadd.xlane.f32.xlu2 %v228_v33 }
  0x8e   :  { %322 = vadd.xlane.f32.xlu0 %v321_v35  ;;  %v333_v35 = vsel %vm143_vm0, %v781_v27, 0.0  ;;  %v347_v27 = vld [vmem:[%s1343_s1 + $0x58] sm:$0xff] }
  0x90   :  { %v290_v42 = vpop.xlane.xlu1 %289  ;;  %v293_v43 = vpop.xlane.xlu2 %292 }
  0x91   :  { %v561_v44 = vperm.slane %v290_v42, %v987_v61  ;;  %v562_v45 = vperm.slane %v293_v43, %v439_v0  ;;  %v251_v46 = vpop.xlane.xlu0 %250 }
  0x92   :  { %v535_v47 = vperm.slane %v251_v46, %v1012_v22 }
  0x93   :  { %v563_v50 = vsel %vm441_vm1, %v562_v45, %v561_v44  ;;  %v463_v45 = vadd.s32 4294967240, %v987_v61 }
  0x94   :  { %v536_v52 = vsel %vm449_vm3, %v535_v47, %v534_v19  ;;  %v330_v19 = vsel %vm143_vm0, %v780_v10, 0.0  ;;  %vm592_vm0 = vcmask 1041409  }
  0x95   :  { %325 = vadd.xlane.f32.xlu1 %v324_v48  ;;  %190 = vadd.xlane.f32.xlu2 %v189_v49 }
  0x96   :  { %283 = vadd.xlane.f32.xlu0 %v282_v51 }
  0x98   :  { %v200_v57 = vpop.xlane.xlu1 %199  ;;  %v254_v58 = vpop.xlane.xlu2 %253 }
  0x99   :  { %v502_v59 = vperm.slane %v200_v57, %v991_v63  ;;  %v537_v60 = vperm.slane %v254_v58, %v1035_v53  ;;  %v158_v62 = vpop.xlane.xlu0 %157 }
  0x9a   :  { %v452_v0 = vperm.slane %v158_v62, %v1035_v53 }
  0x9b   :  { %v503_v3 = vsel %vm445_vm2, %v502_v59, %v501_v34  ;;  %v538_v4 = vsel %vm453_vm4, %v537_v60, %v536_v52 }
  0x9c   :  { %v454_v8 = vsel %vm453_vm4, %v452_v0, %v450_v37 }
  0x9d   :  { %286 = vadd.xlane.f32.xlu1 %v285_v1  ;;  %328 = vadd.xlane.f32.xlu2 %v327_v2 }
  0x9e   :  { %232 = vadd.xlane.f32.xlu0 %v231_v5 }
  0xa0   :  { %v161_v13 = vpop.xlane.xlu1 %160  ;;  %v203_v14 = vpop.xlane.xlu2 %202 }
  0xa1   :  { %v456_v15 = vperm.slane %v161_v13, %v1053_v9  ;;  %v504_v16 = vperm.slane %v203_v14, %v1012_v22  ;;  %v296_v17 = vpop.xlane.xlu0 %295 }
  0xa2   :  { %v564_v18 = vperm.slane %v296_v17, %v991_v63  ;;  %v351_v17 = vld [vmem:[%s1343_s1 + $0x78] sm:$0xff] }
  0xa3   :  { %v458_v21 = vsel %vm457_vm5, %v456_v15, %v454_v8  ;;  %v505_v23 = vsel %vm449_vm3, %v504_v16, %v503_v3  ;;  %597 = vmatpush.msra.mxu0 %v351_v17  ;;  %v1246_v17 = vadd.s32 4294967200, %v987_v61 }
  0xa4   :  { %v565_v25 = vsel %vm445_vm2, %v564_v18, %v563_v50  ;;  %v350_v18 = vld [vmem:[%s1343_s1 + $0x70] sm:$0xff] }
  0xa5   :  { %331 = vadd.xlane.f32.xlu1 %v330_v19  ;;  %238 = vadd.xlane.f32.xlu2 %v237_v20 }
  0xa6   :  { %235 = vadd.xlane.f32.xlu0 %v234_v24  ;;  %598 = vmatpush.msra.mxu0 %v350_v18  ;;  %v349_v24 = vld [vmem:[%s1343_s1 + $0x68] sm:$0xff] }
  0xa8   :  { %v299_v28 = vpop.xlane.xlu1 %298  ;;  %v164_v63 = vpop.xlane.xlu2 %163  ;;  %599 = vmatpush.msra.mxu0 %v349_v24 }
  0xa9   :  { %v566_v29 = vperm.slane %v299_v28, %v1012_v22  ;;  %v460_v30 = vperm.slane %v164_v63, %v459_v26  ;;  %v257_v31 = vpop.xlane.xlu0 %256  ;;  %v346_v28 = vld [vmem:[%s1343_s1 + $0x50] sm:$0xff] }
  0xaa   :  { %v539_v32 = vperm.slane %v257_v31, %v1053_v9  ;;  %v345_v31 = vld [vmem:[%s1343_s1 + $0x48] sm:$0xff] }
  0xab   :  { %v567_v33 = vsel %vm449_vm3, %v566_v29, %v565_v25  ;;  %v462_v34 = vsel %vm461_vm6, %v460_v30, %v458_v21 }
  0xac   :  { %v540_v36 = vsel %vm457_vm5, %v539_v32, %v538_v4  ;;  %v344_v32 = vld [vmem:[%s1343_s1 + $0x40] sm:$0xff] }
  0xae   :  { %334 = vadd.xlane.f32.xlu0 %v333_v35  ;;  %v366_v35 = vld [vmem:[%s1343_s1 + $0xf0] sm:$0xff] }
  0xb0   :  { %v260_v37 = vpop.xlane.xlu1 %259  ;;  %v302_v38 = vpop.xlane.xlu2 %301 }
  0xb1   :  { %v541_v39 = vperm.slane %v260_v37, %v459_v26  ;;  %v568_v40 = vperm.slane %v302_v38, %v1035_v53  ;;  %v206_v41 = vpop.xlane.xlu0 %205 }
  0xb2   :  { %v506_v22 = vperm.slane %v206_v41, %v1035_v53  ;;  %v365_v41 = vld [vmem:[%s1343_s1 + $0xe8] sm:$0xff] }
  0xb3   :  { %v542_v42 = vsel %vm461_vm6, %v541_v39, %v540_v36  ;;  %v569_v43 = vsel %vm453_vm4, %v568_v40, %v567_v33  ;;  %v343_v33 = vld [vmem:[%s1343_s1 + $0x38] sm:$0xff]  ;;  %v342_v36 = vld [vmem:[%s1343_s1 + $0x30] sm:$0xff]  ;;  %v341_v40 = vld [vmem:[%s1343_s1 + $0x28] sm:$0xff] }
  0xb4   :  { %v507_v44 = vsel %vm453_vm4, %v506_v22, %v505_v23  ;;  %v340_v22 = vld [vmem:[%s1343_s1 + $0x20] sm:$0xff] }
  0xb8   :  { %v209_v46 = vpop.xlane.xlu1 %208  ;;  %v263_v47 = vpop.xlane.xlu2 %262 }
  0xb9   :  { %v508_v48 = vperm.slane %v209_v46, %v1053_v9  ;;  %v543_v49 = vperm.slane %v263_v47, %v463_v45  ;;  %v167_v50 = vpop.xlane.xlu0 %166  ;;  %v362_v46 = vld [vmem:[%s1343_s1 + $0xd0] sm:$0xff] }
  0xba   :  { %v464_v51 = vperm.slane %v167_v50, %v463_v45  ;;  %v337_v50 = vld [vmem:[%s1343_s1 + $0x8] sm:$0xff] }
  0xbb   :  { %v509_v52 = vsel %vm457_vm5, %v508_v48, %v507_v44  ;;  %v544_v53 = vsel %vm465_vm7, %v543_v49, %v542_v42  ;;  %v364_v42 = vld [vmem:[%s1343_s1 + $0xe0] sm:$0xff]  ;;  %v363_v44 = vld [vmem:[%s1343_s1 + $0xd8] sm:$0xff] }
  0xbc   :  { %v466_v54 = vsel %vm465_vm7, %v464_v51, %v462_v34  ;;  %v367_v34 = vld [vmem:[%s1343_s1 + $0xf8] sm:$0xff]  ;;  %v361_v51 = vld [vmem:[%s1343_s1 + $0xc8] sm:$0xff] }
  0xbd   :  { %617 = vmatpush.msra.mxu1 %v367_v34 }
  0xbf   :  { %618 = vmatpush.msra.mxu1 %v366_v35 }
  0xc0   :  { %v170_v56 = vpop.xlane.xlu1 %169  ;;  %v212_v57 = vpop.xlane.xlu2 %211 }
  0xc1   :  { %v468_v58 = vperm.slane %v170_v56, %v1082_v55  ;;  %v510_v59 = vperm.slane %v212_v57, %v459_v26  ;;  %v305_v60 = vpop.xlane.xlu0 %304  ;;  %619 = vmatpush.msra.mxu1 %v365_v41  ;;  %v358_v56 = vld [vmem:[%s1343_s1 + $0xb0] sm:$0xff] }
  0xc2   :  { %v570_v62 = vperm.slane %v305_v60, %v1053_v9  ;;  %v357_v60 = vld [vmem:[%s1343_s1 + $0xa8] sm:$0xff] }
  0xc3   :  { %v1087_v0 = vsel %vm469_vm8, %v468_v58, %v466_v54  ;;  %v511_v1 = vsel %vm461_vm6, %v510_v59, %v509_v52  ;;  %620 = vmatpush.msra.mxu1 %v364_v42  ;;  %v336_v52 = vld [vmem:[%s1343_s1] sm:$0xff]  ;;  %v359_v54 = vld [vmem:[%s1343_s1 + $0xb8] sm:$0xff] }
  0xc4   :  { %v571_v2 = vsel %vm457_vm5, %v570_v62, %v569_v43  ;;  %v339_v43 = vld [vmem:[%s1343_s1 + $0x18] sm:$0xff]  ;;  %v356_v62 = vld [vmem:[%s1343_s1 + $0xa0] sm:$0xff] }
  0xc5   :  { %621 = vmatpush.msra.mxu1 %v363_v44 }
  0xc7   :  { %622 = vmatpush.msra.mxu1 %v362_v46 }
  0xc8   :  { %v308_v3 = vpop.xlane.xlu1 %307  ;;  %v1091_v4 = vpop.xlane.xlu2 %172 }
  0xc9   :  { %v572_v5 = vperm.slane %v308_v3, %v459_v26  ;;  %v266_v6 = vpop.xlane.xlu0 %265  ;;  %v348_v26 = vld [vmem:[%s1343_s1 + $0x60] sm:$0xff]  ;;  %623 = vmatpush.msra.mxu1 %v361_v51 }
  0xca   :  { %v545_v7 = vperm.slane %v266_v6, %v1082_v55  ;;  %600 = vmatpush.msra.mxu0 %v348_v26 }
  0xcb   :  { %v573_v8 = vsel %vm461_vm6, %v572_v5, %v571_v2  ;;  %v354_v2 = vld [vmem:[%s1343_s1 + $0x90] sm:$0xff] }
  0xcc   :  { %v1096_v10 = vsel %vm469_vm8, %v545_v7, %v544_v53  ;;  %601 = vmatpush.msra.mxu0 %v347_v27  ;;  %v360_v53 = vld [vmem:[%s1343_s1 + $0xc0] sm:$0xff]  ;;  %v353_v7 = vld [vmem:[%s1343_s1 + $0x88] sm:$0xff] }
  0xcd   :  { %624 = vmatpush.msra.mxu1 %v360_v53 }
  0xce   :  { %602 = vmatpush.msra.mxu0 %v346_v28 }
  0xcf   :  { %625 = vmatpush.msra.mxu1 %v359_v54 }
  0xd0   :  { %v1098_v9 = vpop.xlane.xlu1 %268  ;;  %v311_v11 = vpop.xlane.xlu2 %310  ;;  %603 = vmatpush.msra.mxu0 %v345_v31 }
  0xd1   :  { %v574_v12 = vperm.slane %v311_v11, %v463_v45  ;;  %v215_v13 = vpop.xlane.xlu0 %214  ;;  %626 = vmatpush.msra.mxu1 %v358_v56  ;;  %v1233_v11 = vadd.s32 4294967224, %v987_v61 }
  0xd2   :  { %v512_v14 = vperm.slane %v215_v13, %v463_v45  ;;  %604 = vmatpush.msra.mxu0 %v344_v32  ;;  %v338_v45 = vld [vmem:[%s1343_s1 + $0x10] sm:$0xff]  ;;  %v1239_v13 = vadd.s32 4294967208, %v987_v61 }
  0xd3   :  { %v1101_v15 = vsel %vm465_vm7, %v574_v12, %v573_v8  ;;  %627 = vmatpush.msra.mxu1 %v357_v60  ;;  %v352_v8 = vld [vmem:[%s1343_s1 + $0x80] sm:$0xff]  ;;  %v1236_v12 = vadd.s32 4294967216, %v987_v61 }
  0xd4   :  { %v513_v16 = vsel %vm465_vm7, %v512_v14, %v511_v1  ;;  %605 = vmatpush.msra.mxu0 %v343_v33  ;;  %v355_v1 = vld [vmem:[%s1343_s1 + $0x98] sm:$0xff]  ;;  %v472_v14 = vperm.slane %v1091_v4, %v1233_v11 }
  0xd5   :  { %628 = vmatpush.msra.mxu1 %v356_v62 }
  0xd6   :  { %606 = vmatpush.msra.mxu0 %v342_v36  ;;  %v474_v31 = vsel %vm473_vm9, %v472_v14, %v1087_v0 }
  0xd7   :  { %629 = vmatpush.msra.mxu1 %v355_v1 }
  0xd8   :  { %v218_v19 = vpop.xlane.xlu1 %217  ;;  %v1110_v20 = vpop.xlane.xlu2 %271  ;;  %607 = vmatpush.msra.mxu0 %v341_v40 }
  0xd9   :  { %v514_v21 = vperm.slane %v218_v19, %v1082_v55  ;;  %v1113_v23 = vpop.xlane.xlu0 %175  ;;  %630 = vmatpush.msra.mxu1 %v354_v2  ;;  %v549_v19 = vperm.slane %v1110_v20, %v1236_v12  ;;  %v1265_v20 = vadd.s32 4294967176, %v987_v61 }
  0xda   :  { %608 = vmatpush.msra.mxu0 %v340_v22  ;;  %v476_v4 = vperm.slane %v1113_v23, %v1236_v12 }
  0xdb   :  { %v1119_v25 = vsel %vm469_vm8, %v514_v21, %v513_v16  ;;  %631 = vmatpush.msra.mxu1 %v353_v7  ;;  %v547_v16 = vperm.slane %v1098_v9, %v1233_v11  ;;  %v1253_v21 = vadd.s32 4294967192, %v987_v61  ;;  %v1258_v9 = vadd.s32 4294967184, %v987_v61 }
  0xdc   :  { %609 = vmatpush.msra.mxu0 %v339_v43  ;;  %v478_v35 = vsel %vm477_vm10, %v476_v4, %v474_v31 }
  0xdd   :  { %632 = vmatpush.msra.mxu1 %v352_v8  ;;  %v548_v32 = vsel %vm473_vm9, %v547_v16, %v1096_v10 }
  0xde   :  { %610 = vmatpush.msra.mxu0 %v338_v45 }
  0xe0   :  { %v1130_v63 = vpop.xlane.xlu1 %178  ;;  %v1132_v29 = vpop.xlane.xlu2 %220  ;;  %611 = vmatpush.msra.mxu0 %v337_v50 }
  0xe1   :  { %v1134_v30 = vpop.xlane.xlu0 %313  ;;  %v480_v27 = vperm.slane %v1130_v63, %v1239_v13  ;;  %v550_v63 = vsel %vm477_vm10, %v549_v19, %v548_v32  ;;  %v516_v54 = vperm.slane %v1132_v29, %v1233_v11 }
  0xe2   :  { %612 = vmatpush.msra.mxu0 %v336_v52  ;;  %v576_v56 = vperm.slane %v1134_v30, %v1082_v55 }
  0xe3   :  { %v482_v36 = vsel %vm481_vm11, %v480_v27, %v478_v35  ;;  %v517_v29 = vsel %vm473_vm9, %v516_v54, %v1119_v25  ;;  %v814_v27 = vld [vmem:[%s1344_s2] ss:$0 sm:$0xff] }
  0xe8   :  { %v1154_v37 = vpop.xlane.xlu1 %316  ;;  %v1156_v38 = vpop.xlane.xlu2 %181 }
  0xe9   :  { %v1158_v39 = vpop.xlane.xlu0 %274  ;;  %v484_v23 = vperm.slane %v1156_v38, %v1246_v17  ;;  %v578_v60 = vperm.slane %v1154_v37, %v1233_v11  ;;  %v577_v37 = vsel %vm469_vm8, %v576_v56, %v1101_v15 }
  0xea   :  { %v551_v28 = vperm.slane %v1158_v39, %v1239_v13 }
  0xeb   :  { %v486_v40 = vsel %vm485_vm12, %v484_v23, %v482_v36  ;;  %v579_v7 = vsel %vm473_vm9, %v578_v60, %v577_v37 }
  0xec   :  { %v552_v38 = vsel %vm481_vm11, %v551_v28, %v550_v63 }
  0xf0   :  { %v1184_v47 = vpop.xlane.xlu1 %277  ;;  %v1186_v48 = vpop.xlane.xlu2 %319 }
  0xf1   :  { %v1188_v49 = vpop.xlane.xlu0 %223  ;;  %v553_v33 = vperm.slane %v1184_v47, %v1246_v17  ;;  %v580_v1 = vperm.slane %v1186_v48, %v1236_v12 }
  0xf3   :  { %v554_v41 = vsel %vm485_vm12, %v553_v33, %v552_v38  ;;  %v581_v8 = vsel %vm477_vm10, %v580_v1, %v579_v7 }
  0xf8   :  { %v1208_v57 = vpop.xlane.xlu1 %226  ;;  %v281_v58 = vpop.xlane.xlu2 %280 }
  0xf9   :  { %v185_v59 = vpop.xlane.xlu0 %184  ;;  %v555_v34 = vperm.slane %v281_v58, %v1253_v21  ;;  %v518_v58 = vperm.slane %v1188_v49, %v1236_v12  ;;  %v520_v62 = vperm.slane %v1208_v57, %v1239_v13 }
  0xfa   :  { %v488_v61 = vperm.slane %v185_v59, %v1253_v21 }
  0xfb   :  { %v556_v42 = vsel %vm489_vm13, %v555_v34, %v554_v41  ;;  %v519_v57 = vsel %vm477_vm10, %v518_v58, %v517_v29 }
  0xfc   :  { %v490_v43 = vsel %vm489_vm13, %v488_v61, %v486_v40  ;;  %v521_v25 = vsel %vm481_vm11, %v520_v62, %v519_v57 }
 0x100   :  { %v188_v3 = vpop.xlane.xlu1 %187  ;;  %v1222_v5 = vpop.xlane.xlu2 %229 }
 0x101   :  { %v1224_v6 = vpop.xlane.xlu0 %322  ;;  %v492_v0 = vperm.slane %v188_v3, %v1258_v9  ;;  %v522_v2 = vperm.slane %v1222_v5, %v1246_v17 }
 0x102   :  { %v582_v55 = vperm.slane %v1224_v6, %v1239_v13 }
 0x103   :  { %v494_v46 = vsel %vm493_vm14, %v492_v0, %v490_v43  ;;  %v523_v11 = vsel %vm485_vm12, %v522_v2, %v521_v25 }
 0x104   :  { %v583_v12 = vsel %vm481_vm11, %v582_v55, %v581_v8 }
 0x108   :  { %v1248_v18 = vpop.xlane.xlu1 %325  ;;  %v191_v24 = vpop.xlane.xlu2 %190 }
 0x109   :  { %v284_v26 = vpop.xlane.xlu0 %283  ;;  %v496_v39 = vperm.slane %v191_v24, %v1265_v20  ;;  %v584_v48 = vperm.slane %v1248_v18, %v1246_v17 }
 0x10a   :  { %v557_v10 = vperm.slane %v284_v26, %v1258_v9 }
 0x10b   :  { %v498_v51 = vsel %vm497_vm15, %v496_v39, %v494_v46  ;;  %v585_v16 = vsel %vm485_vm12, %v584_v48, %v583_v12 }
 0x10c   :  { %v558_v47 = vsel %vm493_vm14, %v557_v10, %v556_v42 }
 0x110   :  { %v287_v22 = vpop.xlane.xlu1 %286  ;;  %v329_v50 = vpop.xlane.xlu2 %328 }
 0x111   :  { %v559_v44 = vperm.slane %v287_v22, %v1265_v20  ;;  %v233_v45 = vpop.xlane.xlu0 %232  ;;  %v586_v6 = vperm.slane %v329_v50, %v1253_v21 }
 0x112   :  { %v524_v30 = vperm.slane %v233_v45, %v1253_v21 }
 0x113   :  { %v560_v52 = vsel %vm497_vm15, %v559_v44, %v558_v47  ;;  %v587_v19 = vsel %vm489_vm13, %v586_v6, %v585_v16 }
 0x114   :  { %v593_v53 = vsel %vm592_vm0, %v560_v52, %v498_v51  ;;  %v525_v13 = vsel %vm489_vm13, %v524_v30, %v523_v11 }
 0x115   :  { %613 = vmatmul.f32.vlgmr.msra.gmra.mxu0 %v593_v53 }
 0x118   :  { %v332_v49 = vpop.xlane.xlu1 %331  ;;  %v239_v5 = vpop.xlane.xlu2 %238 }
 0x119   :  { %v236_v59 = vpop.xlane.xlu0 %235  ;;  %v588_v15 = vperm.slane %v332_v49, %v1258_v9  ;;  %v528_v14 = vperm.slane %v239_v5, %v1265_v20 }
 0x11a   :  { %v526_v3 = vperm.slane %v236_v59, %v1258_v9 }
 0x11b   :  { %v589_v24 = vsel %vm493_vm14, %v588_v15, %v587_v19 }
 0x11c   :  { %v527_v18 = vsel %vm493_vm14, %v526_v3, %v525_v13 }
 0x11d   :  { %v529_v26 = vsel %vm497_vm15, %v528_v14, %v527_v18 }
 0x121   :  { %v335_v17 = vpop.xlane.xlu0 %334 }
 0x122   :  { %v590_v21 = vperm.slane %v335_v17, %v1265_v20 }
 0x124   :  { %v591_v4 = vsel %vm497_vm15, %v590_v21, %v589_v24 }
 0x125   :  { %v594_v9 = vsel %vm592_vm0, %v591_v4, %v529_v26 }
 0x126   :  { %633 = vmatmul.f32.vlgmr.msra.gmra.mxu1 %v594_v9 }
 0x192   :  { %v614_v28 = vpop.f32.mrf.mxu0 }
 0x193   :  { %v615_v20 = vadd.f32 %v814_v27, %v614_v28 }
 0x1a3   :  { %v634_v31 = vpop.f32.mrf.mxu1 }
 0x1a4   :  { %v635_v32 = vadd.f32 %v634_v31, %v615_v20 }
 0x1a6   :  { %637 = vst [vmem:[#allocation2] sm:$0x3] %v635_v32 }
 0x1a7   :  { %648 = dma.vmem_to_hbm [thread:$0]  %s644_s4, 32, %s646_s7, [#allocation3]  }
 0x1a8   :  { %839 = dma.done.wait [#allocation3], 32  }
 0x1a9   :  { %840 = vsyncadd [#allocation3], 4294967264 }
 0x1aa   :  { %653 = vsyncpa [#allocation3], 1 }

</bundles_post_ra>
